<compile_context>
chip_gen: v7x
topology: tpu7x:2x2x1
jax: 0.10.0
libtpu: 0.0.40
codegen_flags: <defaults>
</compile_context>

<pallas_src>
import functools

import numpy as np
import jax
import jax.numpy as jnp
from jax.experimental import pallas as pl
from jax.experimental.pallas import tpu as pltpu

LEAKY_SLOPE = 0.01  # nn.LeakyReLU default negative_slope
LANE = 128
SUBLANE = 8


def _round_up(n, m):
    return ((n + m - 1) // m) * m


def _chip_info():
    """Generation-aware knobs: (vmem_capacity_bytes, m_align, n_tensorcores, bf16_vpu)."""
    kind = ""
    try:
        kind = jax.devices()[0].device_kind.lower()
    except Exception:
        pass
    if "v5" in kind:
        cap, m_align, cores, bf16_vpu = 128 << 20, 128, 1, False   # 4x128^2 MXU, no bf16 VPU
    elif "v6" in kind:
        cap, m_align, cores, bf16_vpu = 128 << 20, 256, 1, True    # 2x256^2 MXU, bf16 VPU
    elif "v7" in kind or "7x" in kind:
        cap, m_align, cores, bf16_vpu = 64 << 20, 256, 2, True     # 64 MiB VMEM/TC, 2 TCs
    else:
        cap, m_align, cores, bf16_vpu = 64 << 20, 128, 2, False    # unknown -> conservative
    try:  # refine capacity when the query is available (never grow beyond the table value)
        cap = min(cap, int(pltpu.get_tpu_info().vmem_capacity_bytes))
    except Exception:
        pass
    return cap, m_align, cores, bf16_vpu


def _mlp_kernel(x_ref, *refs, n_linear, compute_dtype, ew_dtype):
    """Fully fused MLP forward for one (block_m, nfeat_p) batch tile.

    refs = (w0, b0, ..., w_{L-1}, b_{L-1}, out_ref).  Weights are pre-cast to compute_dtype and
    biases to ew_dtype in the wrapper, so the grid-invariant params are never re-cast per step.
    Matmuls accumulate in f32 on the MXU; bias-add/LeakyReLU run in ew_dtype (bf16 on v6e/v7x,
    f32 on v5e).  Dropout is eval-mode identity.
    """
    out_ref = refs[-1]
    p = refs[:-1]
    h = x_ref[...]                                     # compute_dtype
    for i in range(n_linear):
        w = p[2 * i][...]                              # (in_p, out_p)  compute_dtype
        b = p[2 * i + 1][...]                          # (1, out_p)     ew_dtype
        acc = jnp.dot(h, w, preferred_element_type=jnp.float32)
        h = acc.astype(ew_dtype) + b
        if i < n_linear - 1:
            h = jnp.maximum(h, LEAKY_SLOPE * h)        # LeakyReLU: one vmul + one vmax
            h = h.astype(compute_dtype)
    out_ref[...] = h.astype(out_ref.dtype)


def _layer_kernel(x_ref, w_ref, b_ref, out_ref, *, apply_act, ew_dtype):
    """One Linear (+ optional LeakyReLU) for the layer-streamed fallback path."""
    acc = jnp.dot(x_ref[...], w_ref[...], preferred_element_type=jnp.float32)
    h = acc.astype(ew_dtype) + b_ref[...]
    if apply_act:
        h = jnp.maximum(h, LEAKY_SLOPE * h)
    out_ref[...] = h.astype(out_ref.dtype)


def regularized_regression_forward(x, params, *, block_m=None, compute_dtype=jnp.bfloat16,
                                   out_dtype=None, force_layerwise=False):
    """Forward pass of RegularizedRegressionModel (eval mode: Dropout == identity).

    x:      (batch, nfeatures) float array.
    params: list of (W, b) with W shape (in, out), b shape (1, out)   [y = x @ W + b].
    compute_dtype: MXU operand dtype (bf16 default = native MXU format; f32 = reference path).
    out_dtype: returned dtype (defaults to x.dtype; pass bf16 to halve HBM write bytes when the
               kernel is store-bound, e.g. huge batch with tiny ntargets on v5e).
    """
    batch, nfeatures = x.shape
    ntargets = params[-1][0].shape[1]
    n_linear = len(params)
    out_dtype = x.dtype if out_dtype is None else out_dtype

    vmem_cap, m_align, n_cores, bf16_vpu = _chip_info()
    cd = np.dtype(compute_dtype)
    # Elementwise (bias add / LeakyReLU) dtype: bf16 only where the VPU supports it (v6e/v7x).
    ed = cd if (bf16_vpu and cd.name == "bfloat16") else np.dtype(np.float32)
    od = np.dtype(out_dtype)

    # ---- lane-pad every width to a multiple of 128 and pre-cast params once (wrapper-side) ----
    # Zero padding is exact: padded columns stay exactly 0 through every Linear + LeakyReLU.
    nfeat_p = _round_up(nfeatures, LANE)
    ntgt_p = _round_up(ntargets, LANE)

    padded = []
    weight_bytes = 0
    max_layer_bytes = 0
    max_width_p = max(nfeat_p, ntgt_p)
    for w, b in params:
        din, dout = w.shape
        din_p, dout_p = _round_up(din, LANE), _round_up(dout, LANE)
        w_p = jnp.pad(w, ((0, din_p - din), (0, dout_p - dout))).astype(cd)
        b_p = jnp.pad(b, ((0, 0), (0, dout_p - dout))).astype(ed)
        padded.append((w_p, b_p, din_p, dout_p))
        lb = din_p * dout_p * cd.itemsize + dout_p * ed.itemsize
        weight_bytes += lb
        max_layer_bytes = max(max_layer_bytes, lb)
        max_width_p = max(max_width_p, din_p, dout_p)

    # ---- generation-aware VMEM limit and batch-tile size ----
    vmem_limit = int(min(vmem_cap * 0.85, vmem_cap - (8 << 20)))
    # Per-batch-row VMEM bytes: 2x x-tile (double-buffered) + 2x out-tile + f32 matmul
    # accumulator + activation temps.
    per_row = (2 * nfeat_p * cd.itemsize + 2 * ntgt_p * od.itemsize
               + max_width_p * (4 + cd.itemsize + ed.itemsize))
    headroom = 4 << 20  # Mosaic internal scratch etc.
    min_block = min(m_align, _round_up(batch, SUBLANE))
    fused_ok = ((not force_layerwise)
                and vmem_limit - weight_bytes - headroom >= per_row * min_block)
    resident = weight_bytes if fused_ok else max_layer_bytes
    tile_budget = vmem_limit - resident - headroom

    if block_m is None:
        if batch <= m_align:
            block_m = _round_up(batch, SUBLANE)          # single tile for small problems
        else:
            bm = min(1024, max(m_align, tile_budget // per_row))
            bm = max(m_align, (bm // m_align) * m_align)  # MXU-full M tiles (256 on v6e/v7x)
            if n_cores >= 2:
                # Keep >= 2 grid steps so the "parallel" batch axis uses both v7x TensorCores.
                bm = min(bm, _round_up(pl.cdiv(batch, 2), m_align))
            block_m = min(bm, _round_up(batch, m_align))
    block_m = max(SUBLANE, _round_up(block_m, SUBLANE))
    batch_p = _round_up(batch, block_m)
    grid = (batch_p // block_m,)

    x_p = jnp.pad(x, ((0, batch_p - batch), (0, nfeat_p - nfeatures))).astype(cd)

    cparams = pltpu.CompilerParams(
        dimension_semantics=("parallel",),   # batch tiles shard across TCs on v7x
        vmem_limit_bytes=vmem_limit,
    )

    if fused_ok:
        # ---- all layers fused in one kernel; every weight VMEM-resident, single-buffered ----
        in_specs = [pl.BlockSpec((block_m, nfeat_p), lambda i: (i, 0))]
        args = [x_p]
        for w_p, b_p, din_p, dout_p in padded:
            args += [w_p, b_p]
            # Grid-invariant blocks: one VMEM buffer is enough (no double-buffering footprint).
            in_specs.append(pl.BlockSpec((din_p, dout_p), lambda i: (0, 0),
                                         pipeline_mode=pl.Buffered(1)))
            in_specs.append(pl.BlockSpec((1, dout_p), lambda i: (0, 0),
                                         pipeline_mode=pl.Buffered(1)))
        out_spec = pl.BlockSpec((block_m, ntgt_p), lambda i: (i, 0))

        kernel = functools.partial(_mlp_kernel, n_linear=n_linear,
                                   compute_dtype=cd, ew_dtype=ed)
        out_p = pl.pallas_call(
            kernel,
            out_shape=jax.ShapeDtypeStruct((batch_p, ntgt_p), od),
            grid_spec=pltpu.PrefetchScalarGridSpec(
                num_scalar_prefetch=0,
                grid=grid,
                in_specs=in_specs,
                out_specs=out_spec,
            ),
            compiler_params=cparams,
        )(*args)
        return out_p[:batch, :ntargets]

    # ---- layer-streamed fallback: one pallas_call per layer, only that layer's weights
    #      VMEM-resident.  Used when the full parameter set exceeds the per-chip VMEM budget
    #      (e.g. very wide/deep nets on v7x's 64 MiB/TC). ----
    # TODO(synk): K/N-tile single layers whose padded weights alone exceed the VMEM budget.
    h = x_p
    for li, (w_p, b_p, din_p, dout_p) in enumerate(padded):
        last = li == n_linear - 1
        layer_out = od if last else cd
        kernel = functools.partial(_layer_kernel, apply_act=not last, ew_dtype=ed)
        h = pl.pallas_call(
            kernel,
            out_shape=jax.ShapeDtypeStruct((batch_p, dout_p), layer_out),
            grid_spec=pltpu.PrefetchScalarGridSpec(
                num_scalar_prefetch=0,
                grid=grid,
                in_specs=[
                    pl.BlockSpec((block_m, din_p), lambda i: (i, 0)),
                    pl.BlockSpec((din_p, dout_p), lambda i: (0, 0),
                                 pipeline_mode=pl.Buffered(1)),
                    pl.BlockSpec((1, dout_p), lambda i: (0, 0),
                                 pipeline_mode=pl.Buffered(1)),
                ],
                out_specs=pl.BlockSpec((block_m, dout_p), lambda i: (i, 0)),
            ),
            compiler_params=cparams,
        )(h, w_p, b_p)
    return h[:batch, :ntargets]


def init_params(key, nfeatures, ntargets, nlayers, hidden_size):
    """Deterministic init mirroring RegularizedRegressionModel's layer shapes.

    Linears: (nfeatures->hidden), (hidden->hidden) x (nlayers-1), (hidden->ntargets).
    PyTorch-style uniform(-1/sqrt(fan_in), 1/sqrt(fan_in)).
    """
    dims = []
    in_dim = nfeatures
    for _ in range(nlayers):
        dims.append((in_dim, hidden_size))
        in_dim = hidden_size
    dims.append((in_dim, ntargets))

    params = []
    for (din, dout) in dims:
        key, kw, kb = jax.random.split(key, 3)
        bound = 1.0 / jnp.sqrt(jnp.float32(din))
        w = jax.random.uniform(kw, (din, dout), jnp.float32, -bound, bound)
        b = jax.random.uniform(kb, (1, dout), jnp.float32, -bound, bound)
        params.append((w, b))
    return params


def reference_forward(x, params):
    """Pure-JAX reference of the PyTorch module forward (eval mode)."""
    h = x
    n = len(params)
    for i, (w, b) in enumerate(params):
        h = jnp.dot(h, w, precision=jax.lax.Precision.HIGHEST) + b
        if i < n - 1:
            h = jnp.where(h > 0, h, LEAKY_SLOPE * h)
    return h


if __name__ == "__main__":
    key = jax.random.PRNGKey(0)

    # Small, module-consistent shapes: plain feature-vector regression MLP.
    batch, nfeatures, ntargets, nlayers, hidden_size = 16, 16, 4, 3, 32
    dropout = 0.5  # nn.Dropout is identity in eval mode

    key, kx = jax.random.split(key)
    x = jax.random.normal(kx, (batch, nfeatures), jnp.float32)
    params = init_params(key, nfeatures, ntargets, nlayers, hidden_size)
    ref = reference_forward(x, params)

    # 1) f32-operand path: tight comparison against the f32 reference.
    out_f32 = jax.block_until_ready(
        regularized_regression_forward(x, params, compute_dtype=jnp.float32))
    assert out_f32.shape == (batch, ntargets)
    assert jnp.allclose(out_f32, ref, atol=1e-4, rtol=1e-4), "mismatch vs reference (f32)"

    # 2) default path: bf16 MXU operands, f32 accumulation (looser tolerance).
    out_bf16 = jax.block_until_ready(regularized_regression_forward(x, params))
    assert out_bf16.shape == (batch, ntargets)
    assert jnp.allclose(out_bf16, ref, atol=1e-1, rtol=1e-1), "mismatch vs reference (bf16)"

    # 3) bigger batch: multi-step grid and the layer-streamed fallback path.
    batch2, nfeat2, ntgt2, nlayers2, hidden2 = 300, 20, 3, 2, 64
    key, kx2, kp2 = jax.random.split(key, 3)
    x2 = jax.random.normal(kx2, (batch2, nfeat2), jnp.float32)
    params2 = init_params(kp2, nfeat2, ntgt2, nlayers2, hidden2)
    ref2 = reference_forward(x2, params2)

    out2 = jax.block_until_ready(
        regularized_regression_forward(x2, params2, compute_dtype=jnp.float32))
    assert jnp.allclose(out2, ref2, atol=1e-4, rtol=1e-4), "mismatch vs reference (auto tile)"

    out2_tiled = jax.block_until_ready(
        regularized_regression_forward(x2, params2, compute_dtype=jnp.float32, block_m=128))
    assert jnp.allclose(out2_tiled, ref2, atol=1e-4, rtol=1e-4), "mismatch vs reference (3-step grid)"

    out2_lw = jax.block_until_ready(
        regularized_regression_forward(x2, params2, compute_dtype=jnp.float32,
                                       block_m=128, force_layerwise=True))
    assert jnp.allclose(out2_lw, ref2, atol=1e-4, rtol=1e-4), "mismatch vs reference (layerwise)"

    print("KERNEL_OK")
</pallas_src>

<mosaic_0001>
module attributes {stable_mosaic.version = 11 : i64} {
  func.func @_mlp_kernel(%arg0: i32, %arg1: memref<16x128xf32, #tpu.memory_space<vmem>>, %arg2: memref<128x128xf32, #tpu.memory_space<vmem>>, %arg3: memref<1x128xf32, #tpu.memory_space<vmem>>, %arg4: memref<128x128xf32, #tpu.memory_space<vmem>>, %arg5: memref<1x128xf32, #tpu.memory_space<vmem>>, %arg6: memref<128x128xf32, #tpu.memory_space<vmem>>, %arg7: memref<1x128xf32, #tpu.memory_space<vmem>>, %arg8: memref<128x128xf32, #tpu.memory_space<vmem>>, %arg9: memref<1x128xf32, #tpu.memory_space<vmem>>, %arg10: memref<16x128xf32, #tpu.memory_space<vmem>>) attributes {dimension_semantics = [#tpu.dimension_semantics<parallel>], iteration_bounds = array<i64: 1>, scalar_prefetch = 0 : i64, scratch_operands = 0 : i64, tpu.core_type = #tpu.core_type<tc>, window_params = [{transform_indices = @transform_0, window_bounds = array<i64: 16, 128>}, {pipeline_mode = #tpu.pipeline_mode<synchronous>, transform_indices = @transform_1, window_bounds = array<i64: 128, 128>}, {pipeline_mode = #tpu.pipeline_mode<synchronous>, transform_indices = @transform_2, window_bounds = array<i64: 1, 128>}, {pipeline_mode = #tpu.pipeline_mode<synchronous>, transform_indices = @transform_3, window_bounds = array<i64: 128, 128>}, {pipeline_mode = #tpu.pipeline_mode<synchronous>, transform_indices = @transform_4, window_bounds = array<i64: 1, 128>}, {pipeline_mode = #tpu.pipeline_mode<synchronous>, transform_indices = @transform_5, window_bounds = array<i64: 128, 128>}, {pipeline_mode = #tpu.pipeline_mode<synchronous>, transform_indices = @transform_6, window_bounds = array<i64: 1, 128>}, {pipeline_mode = #tpu.pipeline_mode<synchronous>, transform_indices = @transform_7, window_bounds = array<i64: 128, 128>}, {pipeline_mode = #tpu.pipeline_mode<synchronous>, transform_indices = @transform_8, window_bounds = array<i64: 1, 128>}, {transform_indices = @transform_9, window_bounds = array<i64: 16, 128>}]} {
    %c0 = arith.constant 0 : index
    %c0_0 = arith.constant 0 : index
    %0 = vector.load %arg1[%c0, %c0_0] : memref<16x128xf32, #tpu.memory_space<vmem>>, vector<16x128xf32>
    %c0_1 = arith.constant 0 : index
    %c0_2 = arith.constant 0 : index
    %1 = vector.load %arg2[%c0_1, %c0_2] : memref<128x128xf32, #tpu.memory_space<vmem>>, vector<128x128xf32>
    %c0_3 = arith.constant 0 : index
    %c0_4 = arith.constant 0 : index
    %2 = vector.load %arg3[%c0_3, %c0_4] : memref<1x128xf32, #tpu.memory_space<vmem>>, vector<1x128xf32>
    %cst = arith.constant dense<0.000000e+00> : vector<16x128xf32>
    %3 = tpu.matmul %0, %1, %cst {dimension_numbers = #tpu.dot_dimension_numbers<[1], [0], [0], [1], [0, 0, 1, 1], [], []>} : vector<16x128xf32>, vector<128x128xf32>, vector<16x128xf32> -> vector<16x128xf32>
    %4 = vector.broadcast %2 : vector<1x128xf32> to vector<16x128xf32>
    %5 = arith.addf %3, %4 : vector<16x128xf32>
    %cst_5 = arith.constant 0.00999999977 : f32
    %6 = vector.broadcast %cst_5 : f32 to vector<16x128xf32>
    %7 = arith.mulf %6, %5 : vector<16x128xf32>
    %8 = arith.maximumf %5, %7 : vector<16x128xf32>
    %c0_6 = arith.constant 0 : index
    %c0_7 = arith.constant 0 : index
    %9 = vector.load %arg4[%c0_6, %c0_7] : memref<128x128xf32, #tpu.memory_space<vmem>>, vector<128x128xf32>
    %c0_8 = arith.constant 0 : index
    %c0_9 = arith.constant 0 : index
    %10 = vector.load %arg5[%c0_8, %c0_9] : memref<1x128xf32, #tpu.memory_space<vmem>>, vector<1x128xf32>
    %cst_10 = arith.constant dense<0.000000e+00> : vector<16x128xf32>
    %11 = tpu.matmul %8, %9, %cst_10 {dimension_numbers = #tpu.dot_dimension_numbers<[1], [0], [0], [1], [0, 0, 1, 1], [], []>} : vector<16x128xf32>, vector<128x128xf32>, vector<16x128xf32> -> vector<16x128xf32>
    %12 = vector.broadcast %10 : vector<1x128xf32> to vector<16x128xf32>
    %13 = arith.addf %11, %12 : vector<16x128xf32>
    %cst_11 = arith.constant 0.00999999977 : f32
    %14 = vector.broadcast %cst_11 : f32 to vector<16x128xf32>
    %15 = arith.mulf %14, %13 : vector<16x128xf32>
    %16 = arith.maximumf %13, %15 : vector<16x128xf32>
    %c0_12 = arith.constant 0 : index
    %c0_13 = arith.constant 0 : index
    %17 = vector.load %arg6[%c0_12, %c0_13] : memref<128x128xf32, #tpu.memory_space<vmem>>, vector<128x128xf32>
    %c0_14 = arith.constant 0 : index
    %c0_15 = arith.constant 0 : index
    %18 = vector.load %arg7[%c0_14, %c0_15] : memref<1x128xf32, #tpu.memory_space<vmem>>, vector<1x128xf32>
    %cst_16 = arith.constant dense<0.000000e+00> : vector<16x128xf32>
    %19 = tpu.matmul %16, %17, %cst_16 {dimension_numbers = #tpu.dot_dimension_numbers<[1], [0], [0], [1], [0, 0, 1, 1], [], []>} : vector<16x128xf32>, vector<128x128xf32>, vector<16x128xf32> -> vector<16x128xf32>
    %20 = vector.broadcast %18 : vector<1x128xf32> to vector<16x128xf32>
    %21 = arith.addf %19, %20 : vector<16x128xf32>
    %cst_17 = arith.constant 0.00999999977 : f32
    %22 = vector.broadcast %cst_17 : f32 to vector<16x128xf32>
    %23 = arith.mulf %22, %21 : vector<16x128xf32>
    %24 = arith.maximumf %21, %23 : vector<16x128xf32>
    %c0_18 = arith.constant 0 : index
    %c0_19 = arith.constant 0 : index
    %25 = vector.load %arg8[%c0_18, %c0_19] : memref<128x128xf32, #tpu.memory_space<vmem>>, vector<128x128xf32>
    %c0_20 = arith.constant 0 : index
    %c0_21 = arith.constant 0 : index
    %26 = vector.load %arg9[%c0_20, %c0_21] : memref<1x128xf32, #tpu.memory_space<vmem>>, vector<1x128xf32>
    %cst_22 = arith.constant dense<0.000000e+00> : vector<16x128xf32>
    %27 = tpu.matmul %24, %25, %cst_22 {dimension_numbers = #tpu.dot_dimension_numbers<[1], [0], [0], [1], [0, 0, 1, 1], [], []>} : vector<16x128xf32>, vector<128x128xf32>, vector<16x128xf32> -> vector<16x128xf32>
    %28 = vector.broadcast %26 : vector<1x128xf32> to vector<16x128xf32>
    %29 = arith.addf %27, %28 : vector<16x128xf32>
    %c0_23 = arith.constant 0 : index
    %c0_24 = arith.constant 0 : index
    %30 = vector.load %arg10[%c0_23, %c0_24] : memref<16x128xf32, #tpu.memory_space<vmem>>, vector<16x128xf32>
    tpu.vector_store %arg10[%c0_23, %c0_24], %29 {strides = array<i32>} : memref<16x128xf32, #tpu.memory_space<vmem>>, vector<16x128xf32>,
    return
  }
  func.func @transform_0(%arg0: i32) -> (i32, i32) {
    %c0_i32 = arith.constant 0 : i32
    %c0_i32_0 = arith.constant 0 : i32
    return %arg0, %c0_i32 : i32, i32
  }
  func.func @transform_1(%arg0: i32) -> (i32, i32) {
    %c0_i32 = arith.constant 0 : i32
    %c0_i32_0 = arith.constant 0 : i32
    %c0_i32_1 = arith.constant 0 : i32
    return %c0_i32, %c0_i32_0 : i32, i32
  }
  func.func @transform_2(%arg0: i32) -> (i32, i32) {
    %c0_i32 = arith.constant 0 : i32
    %c0_i32_0 = arith.constant 0 : i32
    %c0_i32_1 = arith.constant 0 : i32
    return %c0_i32, %c0_i32_0 : i32, i32
  }
  func.func @transform_3(%arg0: i32) -> (i32, i32) {
    %c0_i32 = arith.constant 0 : i32
    %c0_i32_0 = arith.constant 0 : i32
    %c0_i32_1 = arith.constant 0 : i32
    return %c0_i32, %c0_i32_0 : i32, i32
  }
  func.func @transform_4(%arg0: i32) -> (i32, i32) {
    %c0_i32 = arith.constant 0 : i32
    %c0_i32_0 = arith.constant 0 : i32
    %c0_i32_1 = arith.constant 0 : i32
    return %c0_i32, %c0_i32_0 : i32, i32
  }
  func.func @transform_5(%arg0: i32) -> (i32, i32) {
    %c0_i32 = arith.constant 0 : i32
    %c0_i32_0 = arith.constant 0 : i32
    %c0_i32_1 = arith.constant 0 : i32
    return %c0_i32, %c0_i32_0 : i32, i32
  }
  func.func @transform_6(%arg0: i32) -> (i32, i32) {
    %c0_i32 = arith.constant 0 : i32
    %c0_i32_0 = arith.constant 0 : i32
    %c0_i32_1 = arith.constant 0 : i32
    return %c0_i32, %c0_i32_0 : i32, i32
  }
  func.func @transform_7(%arg0: i32) -> (i32, i32) {
    %c0_i32 = arith.constant 0 : i32
    %c0_i32_0 = arith.constant 0 : i32
    %c0_i32_1 = arith.constant 0 : i32
    return %c0_i32, %c0_i32_0 : i32, i32
  }
  func.func @transform_8(%arg0: i32) -> (i32, i32) {
    %c0_i32 = arith.constant 0 : i32
    %c0_i32_0 = arith.constant 0 : i32
    %c0_i32_1 = arith.constant 0 : i32
    return %c0_i32, %c0_i32_0 : i32, i32
  }
  func.func @transform_9(%arg0: i32) -> (i32, i32) {
    %c0_i32 = arith.constant 0 : i32
    %c0_i32_0 = arith.constant 0 : i32
    return %arg0, %c0_i32 : i32, i32
  }
}

</mosaic_0001>

<bundles_post_ra>
// kernel: tpu_custom_call.1
= control target key start
LH: loop header
LB: loop body
LE: loop exit
PB: predicated region body
PF: predicated region fallthrough
CT: control target
= control target key end

     0   :  { %14 = vsyncpa [#allocation3], 0  ;;  %s1194_s0 = inlined_call_operand.hbm [shape: f32[16,128], index: 0, kind: input, shape index: {}]   ;;  %s1195_s1 = inlined_call_operand.hbm [shape: f32[128,128], index: 1, kind: input, shape index: {}]   ;;  %s1196_s2 = inlined_call_operand.vmem [shape: f32[1,128], index: 2, kind: input, shape index: {}]   ;;  %s1197_s3 = inlined_call_operand.hbm [shape: f32[128,128], index: 3, kind: input, shape index: {}]   ;;  %s1198_s4 = inlined_call_operand.vmem [shape: f32[1,128], index: 4, kind: input, shape index: {}]   ;;  %s1199_s5 = inlined_call_operand.hbm [shape: f32[128,128], index: 5, kind: input, shape index: {}]   ;;  %s1200_s6 = inlined_call_operand.vmem [shape: f32[1,128], index: 6, kind: input, shape index: {}]   ;;  %s1201_s7 = inlined_call_operand.hbm [shape: f32[128,128], index: 7, kind: input, shape index: {}]   ;;  %s1202_s8 = inlined_call_operand.vmem [shape: f32[1,128], index: 8, kind: input, shape index: {}]   ;;  %s1203_s9 = inlined_call_operand.hbm [shape: f32[16,128], index: 9, kind: output, shape index: {}]  }
   0x1   :  { %15 = vsyncpa [#allocation6], 0 }
   0x2   :  { %16 = vsyncpa [#allocation9], 0 }
   0x3   :  { %17 = vsyncpa [#allocation4], 0  ;;  %s1020_s30 = smov [#allocation5]   ;;  %s1021_s11 = smov [#allocation8]  }
   0x4   :  { %s35_s10 = sshll.u32 %s1020_s30, 4  ;;  %s63_s12 = sshll.u32 %s1021_s11, 4  ;;  %s36_s10 = int_to_ptr.vmem [resolvable:$true] %s35_s10  ;;  %s1078_s12 = int_to_ptr.vmem [resolvable:$true] %s63_s12 }
   0x5   :  { %s880_s15 = scalar_lea.hbm %s1195_s1, 2048 }
   0x6   :  { %p881_p0 = scmp.ne.s32.totalorder %s1195_s1, %s880_s15  ;;  %p884_p1 = scmp.lt.u32.totalorder %s880_s15, %s1195_s1 }
   0x8   :  { %p886_p2 = pnand %p884_p1, %p881_p0 }
   0xa   :  { %889 = shalt.err (!%p886_p2)
}
   0xb   :  { %s890_s20 = scalar_lea.vmem %s36_s10, 2048  ;;  %p895_p4 = scmp.lt.s32.totalorder %s36_s10, %s36_s10 }
   0xc   :  { %p891_p3 = scmp.ne.s32.totalorder %s36_s10, %s890_s20  ;;  %p896_p5 = scmp.lt.s32.totalorder %s890_s20, %s890_s20 }
   0xe   :  { %p897_p6 = por %p896_p5, %p895_p4 }
  0x10   :  { %p898_p7 = pnand %p897_p6, %p891_p3 }
  0x12   :  { %901 = shalt.err (!%p898_p7)
}
  0x13   :  { %s1022_s21 = smov 128   ;;  %s1023_s22 = smov 8  }
  0x14   :  { %41 = dma.hbm_to_vmem [thread:$0]  %s1195_s1, 2048, %s36_s10, [#allocation6], %s1022_s21, %s1022_s21, %s1023_s22  }
  0x15   :  { %s902_s27 = scalar_lea.hbm %s1199_s5, 2048 }
  0x16   :  { %p903_p8 = scmp.ne.s32.totalorder %s1199_s5, %s902_s27  ;;  %p906_p9 = scmp.lt.u32.totalorder %s902_s27, %s1199_s5 }
  0x18   :  { %p908_p10 = pnand %p906_p9, %p903_p8 }
  0x1a   :  { %911 = shalt.err (!%p908_p10)
}
  0x1b   :  { %s912_s13 = scalar_lea.vmem %s1078_s12, 2048  ;;  %p917_p12 = scmp.lt.s32.totalorder %s1078_s12, %s1078_s12 }
  0x1c   :  { %p913_p11 = scmp.ne.s32.totalorder %s1078_s12, %s912_s13  ;;  %p918_p13 = scmp.lt.s32.totalorder %s912_s13, %s912_s13 }
  0x1e   :  { %p919_p0 = por %p918_p13, %p917_p12 }
  0x20   :  { %p920_p1 = pnand %p919_p0, %p913_p11 }
  0x22   :  { %923 = shalt.err (!%p920_p1)
}
  0x23   :  { %69 = dma.hbm_to_vmem [thread:$0]  %s1199_s5, 2048, %s1078_s12, [#allocation9], %s1022_s21, %s1022_s21, %s1023_s22  }
  0x24   :  { %s1024_s14 = smov [#allocation2]   ;;  %s1025_s16 = smov [#allocation7]  }
  0x25   :  { %s23_s15 = sshll.u32 %s1024_s14, 4  ;;  %s49_s17 = sshll.u32 %s1025_s16, 4  ;;  %s24_s15 = int_to_ptr.vmem [resolvable:$true] %s23_s15  ;;  %s1115_s17 = int_to_ptr.vmem [resolvable:$true] %s49_s17 }
  0x26   :  { %s924_s20 = scalar_lea.hbm %s1194_s0, 256 }
  0x27   :  { %p925_p2 = scmp.ne.s32.totalorder %s1194_s0, %s924_s20  ;;  %p928_p3 = scmp.lt.u32.totalorder %s924_s20, %s1194_s0 }
  0x29   :  { %p930_p4 = pnand %p928_p3, %p925_p2 }
  0x2b   :  { %933 = shalt.err (!%p930_p4)
}
  0x2c   :  { %s934_s5 = scalar_lea.vmem %s24_s15, 256  ;;  %p939_p6 = scmp.lt.s32.totalorder %s24_s15, %s24_s15 }
  0x2d   :  { %p935_p5 = scmp.ne.s32.totalorder %s24_s15, %s934_s5  ;;  %p940_p7 = scmp.lt.s32.totalorder %s934_s5, %s934_s5 }
  0x2f   :  { %p941_p8 = por %p940_p7, %p939_p6 }
  0x31   :  { %p942_p9 = pnand %p941_p8, %p935_p5 }
  0x33   :  { %945 = shalt.err (!%p942_p9)
}
  0x34   :  { %29 = dma.hbm_to_vmem [thread:$0]  %s1194_s0, 256, %s24_s15, [#allocation3], %s1022_s21, %s1022_s21, %s1023_s22  }
  0x35   :  { %s946_s30 = scalar_lea.hbm %s1197_s3, 2048 }
  0x36   :  { %p947_p10 = scmp.ne.s32.totalorder %s1197_s3, %s946_s30  ;;  %p950_p11 = scmp.lt.u32.totalorder %s946_s30, %s1197_s3 }
  0x38   :  { %p952_p12 = pnand %p950_p11, %p947_p10 }
  0x3a   :  { %955 = shalt.err (!%p952_p12)
}
  0x3b   :  { %s956_s14 = scalar_lea.vmem %s1115_s17, 2048  ;;  %p961_p0 = scmp.lt.s32.totalorder %s1115_s17, %s1115_s17 }
  0x3c   :  { %p957_p13 = scmp.ne.s32.totalorder %s1115_s17, %s956_s14  ;;  %p962_p1 = scmp.lt.s32.totalorder %s956_s14, %s956_s14 }
  0x3e   :  { %p963_p2 = por %p962_p1, %p961_p0 }
  0x40   :  { %p964_p3 = pnand %p963_p2, %p957_p13 }
  0x42   :  { %967 = shalt.err (!%p964_p3)
}
  0x43   :  { %55 = dma.hbm_to_vmem [thread:$0]  %s1197_s3, 2048, %s1115_s17, [#allocation6], %s1022_s21, %s1022_s21, %s1023_s22  }
  0x44   :  { %s1026_s16 = smov [#allocation10]   ;;  %s968_s23 = scalar_lea.hbm %s1201_s7, 2048 }
  0x45   :  { %s77_s18 = sshll.u32 %s1026_s16, 4  ;;  %p969_p4 = scmp.ne.s32.totalorder %s1201_s7, %s968_s23  ;;  %s78_s18 = int_to_ptr.vmem [resolvable:$true] %s77_s18 }
  0x46   :  { %p972_p5 = scmp.lt.u32.totalorder %s968_s23, %s1201_s7 }
  0x48   :  { %p974_p6 = pnand %p972_p5, %p969_p4 }
  0x4a   :  { %977 = shalt.err (!%p974_p6)
}
  0x4b   :  { %s978_s12 = scalar_lea.vmem %s78_s18, 2048  ;;  %p983_p8 = scmp.lt.s32.totalorder %s78_s18, %s78_s18 }
  0x4c   :  { %p979_p7 = scmp.ne.s32.totalorder %s78_s18, %s978_s12  ;;  %p984_p9 = scmp.lt.s32.totalorder %s978_s12, %s978_s12 }
  0x4e   :  { %p985_p10 = por %p984_p9, %p983_p8 }
  0x50   :  { %p986_p11 = pnand %p985_p10, %p979_p7 }
  0x52   :  { %989 = shalt.err (!%p986_p11)
}
  0x53   :  { %83 = dma.hbm_to_vmem [thread:$0]  %s1201_s7, 2048, %s78_s18, [#allocation9], %s1022_s21, %s1022_s21, %s1023_s22  }
  0x54   :  { %1012 = dma.done.wait [#allocation3], 256  }
  0x55   :  { %1013 = vsyncadd [#allocation3], 4294967040 }
  0x56   :  { %1014 = dma.done.wait [#allocation6], 4096  }
  0x57   :  { %1015 = vsyncadd [#allocation6], 4294963200 }
  0x58   :  { %1016 = dma.done.wait [#allocation9], 4096  }
  0x59   :  { %1017 = vsyncadd [#allocation9], 4294963200  ;;  %v103_v0 = vld [vmem:[#allocation5] sm:$0xff]  ;;  %v104_v1 = vld [vmem:[#allocation5 + $0x8] sm:$0xff]  ;;  %s1027_s13 = smov [#allocation11]  }
  0x5a   :  { %v105_v2 = vld [vmem:[#allocation5 + $0x10] sm:$0xff]  ;;  %v744_v3 = vpack.c.bf16 %v104_v1, %v103_v0  ;;  %v106_v4 = vld [vmem:[#allocation5 + $0x18] sm:$0xff]  ;;  %v107_v6 = vld [vmem:[#allocation5 + $0x20] sm:$0xff]  ;;  %s514_s1 = sshll.u32 %s1027_s13, 4  ;;  %s515_s1 = int_to_ptr.vmem [resolvable:$true] %s514_s1 }
  0x5b   :  { %v748_v5 = vpack.c.bf16 %v106_v4, %v105_v2  ;;  %v108_v7 = vld [vmem:[#allocation5 + $0x28] sm:$0xff]  ;;  %v109_v9 = vld [vmem:[#allocation5 + $0x30] sm:$0xff]  ;;  %v110_v10 = vld [vmem:[#allocation5 + $0x38] sm:$0xff]  ;;  %p995_p13 = scmp.lt.s32.totalorder %s515_s1, %s515_s1 }
  0x5c   :  { %745 = vmatprep.subr.bf16.mxu0 %v744_v3  ;;  %v752_v8 = vpack.c.bf16 %v108_v7, %v107_v6  ;;  %v101_v11 = vld [vmem:[#allocation2] sm:$0xff]  ;;  %v205_v12 = vld [vmem:[#allocation7] sm:$0xff]  ;;  %v206_v13 = vld [vmem:[#allocation7 + $0x8] sm:$0xff]  ;;  %v756_v20 = vpack.c.bf16 %v110_v10, %v109_v9 }
  0x5d   :  { %747 = vmatpush3.bf16.msra.mxu0 %v744_v3  ;;  %636 = vmatprep.mubr.f32.mxu0 %v101_v11  ;;  %v207_v14 = vld [vmem:[#allocation7 + $0x10] sm:$0xff]  ;;  %v776_v15 = vpack.c.bf16 %v206_v13, %v205_v12  ;;  %v208_v16 = vld [vmem:[#allocation7 + $0x18] sm:$0xff]  ;;  %v209_v18 = vld [vmem:[#allocation7 + $0x20] sm:$0xff] }
  0x5e   :  { %749 = vmatprep.subr.bf16.mxu0 %v748_v5  ;;  %v780_v17 = vpack.c.bf16 %v208_v16, %v207_v14  ;;  %v210_v19 = vld [vmem:[#allocation7 + $0x28] sm:$0xff]  ;;  %v111_v21 = vld [vmem:[#allocation5 + $0x40] sm:$0xff]  ;;  %v211_v24 = vld [vmem:[#allocation7 + $0x30] sm:$0xff] }
  0x5f   :  { %777 = vmatprep.subr.bf16.mxu1 %v776_v15  ;;  %v112_v22 = vld [vmem:[#allocation5 + $0x48] sm:$0xff]  ;;  %v784_v23 = vpack.c.bf16 %v210_v19, %v209_v18  ;;  %v212_v25 = vld [vmem:[#allocation7 + $0x38] sm:$0xff]  ;;  %v113_v27 = vld [vmem:[#allocation5 + $0x50] sm:$0xff] }
  0x60   :  { %779 = vmatpush3.bf16.msra.mxu1 %v776_v15  ;;  %v760_v26 = vpack.c.bf16 %v112_v22, %v111_v21  ;;  %v114_v28 = vld [vmem:[#allocation5 + $0x58] sm:$0xff]  ;;  %v788_v29 = vpack.c.bf16 %v212_v25, %v211_v24  ;;  %v213_v30 = vld [vmem:[#allocation7 + $0x40] sm:$0xff]  ;;  %v214_v31 = vld [vmem:[#allocation7 + $0x48] sm:$0xff] }
  0x61   :  { %751 = vmatpush3.bf16.msra.mxu0 %v748_v5  ;;  %781 = vmatprep.subr.bf16.mxu1 %v780_v17  ;;  %v764_v32 = vpack.c.bf16 %v114_v28, %v113_v27  ;;  %v115_v33 = vld [vmem:[#allocation5 + $0x60] sm:$0xff]  ;;  %v116_v34 = vld [vmem:[#allocation5 + $0x68] sm:$0xff]  ;;  %v792_v35 = vpack.c.bf16 %v214_v31, %v213_v30  ;;  %v215_v36 = vld [vmem:[#allocation7 + $0x50] sm:$0xff] }
  0x62   :  { %753 = vmatprep.subr.bf16.mxu0 %v752_v8  ;;  %v216_v37 = vld [vmem:[#allocation7 + $0x58] sm:$0xff]  ;;  %v768_v38 = vpack.c.bf16 %v116_v34, %v115_v33  ;;  %v117_v39 = vld [vmem:[#allocation5 + $0x70] sm:$0xff]  ;;  %v217_v44 = vld [vmem:[#allocation7 + $0x60] sm:$0xff] }
  0x63   :  { %v118_v40 = vld [vmem:[#allocation5 + $0x78] sm:$0xff]  ;;  %v796_v41 = vpack.c.bf16 %v216_v37, %v215_v36  ;;  %v218_v45 = vld [vmem:[#allocation7 + $0x68] sm:$0xff]  ;;  %v219_v47 = vld [vmem:[#allocation7 + $0x70] sm:$0xff] }
  0x64   :  { %783 = vmatpush3.bf16.msra.mxu1 %v780_v17  ;;  %v772_v42 = vpack.c.bf16 %v118_v40, %v117_v39  ;;  %v102_v43 = vld [vmem:[#allocation2 + $0x8] sm:$0xff]  ;;  %v800_v46 = vpack.c.bf16 %v218_v45, %v217_v44  ;;  %v307_v50 = vld [vmem:[#allocation8] sm:$0xff]  ;;  %v308_v51 = vld [vmem:[#allocation8 + $0x8] sm:$0xff] }
  0x65   :  { %755 = vmatpush3.bf16.msra.mxu0 %v752_v8  ;;  %785 = vmatprep.subr.bf16.mxu1 %v784_v23  ;;  %v220_v48 = vld [vmem:[#allocation7 + $0x78] sm:$0xff]  ;;  %v309_v52 = vld [vmem:[#allocation8 + $0x10] sm:$0xff]  ;;  %v808_v53 = vpack.c.bf16 %v308_v51, %v307_v50  ;;  %v311_v56 = vld [vmem:[#allocation8 + $0x20] sm:$0xff] }
  0x66   :  { %757 = vmatprep.subr.bf16.mxu0 %v756_v20  ;;  %v804_v49 = vpack.c.bf16 %v220_v48, %v219_v47  ;;  %v310_v54 = vld [vmem:[#allocation8 + $0x18] sm:$0xff]  ;;  %v312_v57 = vld [vmem:[#allocation8 + $0x28] sm:$0xff]  ;;  %v313_v59 = vld [vmem:[#allocation8 + $0x30] sm:$0xff] }
  0x67   :  { %v812_v55 = vpack.c.bf16 %v310_v54, %v309_v52  ;;  %v816_v58 = vpack.c.bf16 %v312_v57, %v311_v56  ;;  %v314_v60 = vld [vmem:[#allocation8 + $0x38] sm:$0xff]  ;;  %v315_v62 = vld [vmem:[#allocation8 + $0x40] sm:$0xff]  ;;  %v316_v63 = vld [vmem:[#allocation8 + $0x48] sm:$0xff] }
  0x68   :  { %787 = vmatpush3.bf16.msra.mxu1 %v784_v23  ;;  %v820_v61 = vpack.c.bf16 %v314_v60, %v313_v59  ;;  %v824_v0 = vpack.c.bf16 %v316_v63, %v315_v62  ;;  %v317_v1 = vld [vmem:[#allocation8 + $0x50] sm:$0xff]  ;;  %v318_v2 = vld [vmem:[#allocation8 + $0x58] sm:$0xff]  ;;  %v319_v13 = vld [vmem:[#allocation8 + $0x60] sm:$0xff] }
  0x69   :  { %759 = vmatpush3.bf16.msra.mxu0 %v756_v20  ;;  %789 = vmatprep.subr.bf16.mxu1 %v788_v29  ;;  %v828_v3 = vpack.c.bf16 %v318_v2, %v317_v1  ;;  %v528_v4 = vld [vmem:[%s1196_s2] ss:$0 sm:$0xff]  ;;  %v320_v14 = vld [vmem:[#allocation8 + $0x68] sm:$0xff]  ;;  %v322_v17 = vld [vmem:[#allocation8 + $0x78] sm:$0xff] }
  0x6a   :  { %761 = vmatprep.subr.bf16.mxu0 %v760_v26  ;;  %v832_v15 = vpack.c.bf16 %v320_v14, %v319_v13  ;;  %v321_v16 = vld [vmem:[#allocation8 + $0x70] sm:$0xff]  ;;  %v409_v19 = vld [vmem:[#allocation10] sm:$0xff]  ;;  %v410_v20 = vld [vmem:[#allocation10 + $0x8] sm:$0xff] }
  0x6b   :  { %v836_v18 = vpack.c.bf16 %v322_v17, %v321_v16  ;;  %v411_v21 = vld [vmem:[#allocation10 + $0x10] sm:$0xff]  ;;  %v840_v22 = vpack.c.bf16 %v410_v20, %v409_v19  ;;  %v412_v23 = vld [vmem:[#allocation10 + $0x18] sm:$0xff]  ;;  %v413_v25 = vld [vmem:[#allocation10 + $0x20] sm:$0xff] }
  0x6c   :  { %791 = vmatpush3.bf16.msra.mxu1 %v788_v29  ;;  %v844_v24 = vpack.c.bf16 %v412_v23, %v411_v21  ;;  %v415_v28 = vld [vmem:[#allocation10 + $0x30] sm:$0xff]  ;;  %v416_v29 = vld [vmem:[#allocation10 + $0x38] sm:$0xff]  ;;  %v417_v31 = vld [vmem:[#allocation10 + $0x40] sm:$0xff] }
  0x6d   :  { %763 = vmatpush3.bf16.msra.mxu0 %v760_v26  ;;  %793 = vmatprep.subr.bf16.mxu1 %v792_v35  ;;  %v414_v26 = vld [vmem:[#allocation10 + $0x28] sm:$0xff]  ;;  %v852_v30 = vpack.c.bf16 %v416_v29, %v415_v28  ;;  %v419_v34 = vld [vmem:[#allocation10 + $0x50] sm:$0xff]  ;;  %v424_v50 = vld [vmem:[#allocation10 + $0x78] sm:$0xff] }
  0x6e   :  { %765 = vmatprep.subr.bf16.mxu0 %v764_v32  ;;  %v848_v27 = vpack.c.bf16 %v414_v26, %v413_v25  ;;  %v529_v37 = vld [vmem:[%s1198_s4] ss:$0 sm:$0xff]  ;;  %v422_v47 = vld [vmem:[#allocation10 + $0x68] sm:$0xff] }
  0x6f   :  { %v530_v52 = vld [vmem:[%s1200_s6] ss:$0 sm:$0xff]  ;;  %s990_s6 = scalar_lea.vmem %s515_s1, 256 }
  0x70   :  { %795 = vmatpush3.bf16.msra.mxu1 %v792_v35  ;;  %v420_v35 = vld [vmem:[#allocation10 + $0x58] sm:$0xff]  ;;  %p991_p12 = scmp.ne.s32.totalorder %s515_s1, %s990_s6  ;;  %p996_p0 = scmp.lt.s32.totalorder %s990_s6, %s990_s6 }
  0x71   :  { %767 = vmatpush3.bf16.msra.mxu0 %v764_v32  ;;  %797 = vmatprep.subr.bf16.mxu1 %v796_v41  ;;  %v418_v32 = vld [vmem:[#allocation10 + $0x48] sm:$0xff]  ;;  %v860_v36 = vpack.c.bf16 %v420_v35, %v419_v34 }
  0x72   :  { %769 = vmatprep.subr.bf16.mxu0 %v768_v38  ;;  %v856_v33 = vpack.c.bf16 %v418_v32, %v417_v31  ;;  %p997_p1 = por %p996_p0, %p995_p13 }
  0x74   :  { %799 = vmatpush3.bf16.msra.mxu1 %v796_v41  ;;  %p998_p2 = pnand %p997_p1, %p991_p12 }
  0x75   :  { %771 = vmatpush3.bf16.msra.mxu0 %v768_v38  ;;  %801 = vmatprep.subr.bf16.mxu1 %v800_v46 }
  0x76   :  { %773 = vmatprep.subr.bf16.mxu0 %v772_v42 }
  0x78   :  { %803 = vmatpush3.bf16.msra.mxu1 %v800_v46  ;;  %v421_v46 = vld [vmem:[#allocation10 + $0x60] sm:$0xff] }
  0x79   :  { %775 = vmatpush3.bf16.msra.mxu0 %v772_v42  ;;  %805 = vmatprep.subr.bf16.mxu1 %v804_v49  ;;  %v864_v48 = vpack.c.bf16 %v422_v47, %v421_v46 }
  0x7a   :  { %809 = vmatprep.subr.bf16.mxu0 %v808_v53 }
  0x7c   :  { %637 = vmatmul.mubr.f32.vlgmr.msra.gmra.mrb[0].mxu0 %v102_v43  ;;  %807 = vmatpush3.bf16.msra.mxu1 %v804_v49  ;;  %v423_v49 = vld [vmem:[#allocation10 + $0x70] sm:$0xff] }
  0x7d   :  { %811 = vmatpush3.bf16.msra.mxu0 %v808_v53  ;;  %841 = vmatprep.subr.bf16.mxu1 %v840_v22  ;;  %v868_v51 = vpack.c.bf16 %v424_v50, %v423_v49 }
  0x7e   :  { %813 = vmatprep.subr.bf16.mxu0 %v812_v55 }
  0x81   :  { %815 = vmatpush3.bf16.msra.mxu0 %v812_v55 }
  0x82   :  { %817 = vmatprep.subr.bf16.mxu0 %v816_v58 }
  0x85   :  { %819 = vmatpush3.bf16.msra.mxu0 %v816_v58 }
  0x86   :  { %821 = vmatprep.subr.bf16.mxu0 %v820_v61 }
  0x89   :  { %823 = vmatpush3.bf16.msra.mxu0 %v820_v61  ;;  %v531_v61 = vld [vmem:[%s1202_s8] ss:$0 sm:$0xff] }
  0x8a   :  { %825 = vmatprep.subr.bf16.mxu0 %v824_v0 }
  0x8d   :  { %827 = vmatpush3.bf16.msra.mxu0 %v824_v0 }
  0x8e   :  { %829 = vmatprep.subr.bf16.mxu0 %v828_v3 }
  0x91   :  { %831 = vmatpush3.bf16.msra.mxu0 %v828_v3 }
  0x92   :  { %833 = vmatprep.subr.bf16.mxu0 %v832_v15 }
  0x95   :  { %835 = vmatpush3.bf16.msra.mxu0 %v832_v15 }
  0x96   :  { %837 = vmatprep.subr.bf16.mxu0 %v836_v18 }
  0x99   :  { %839 = vmatpush3.bf16.msra.mxu0 %v836_v18 }
 0x14f   :  { %v638_v5 = vpop.f32.mrb[0].mxu0 }
 0x150   :  { %v198_v6 = vadd.f32 %v638_v5, %v528_v4  ;;  %v192_v7 = vpop.f32.mrb[1].mxu0 }
 0x151   :  { %v193_v8 = vadd.f32 %v528_v4, %v192_v7 }
 0x152   :  { %v202_v9 = vmul.f32 0.01, %v198_v6 }
 0x153   :  { %v201_v10 = vmul.f32 0.01, %v193_v8 }
 0x154   :  { %v204_v12 = vmax.f32 %v198_v6, %v202_v9 }
 0x155   :  { %v203_v11 = vmax.f32 %v193_v8, %v201_v10 }
 0x157   :  { %671 = vmatprep.mubr.f32.mxu1 %v203_v11 }
 0x158   :  { %672 = vmatmul.mubr.f32.vlgmr.msra.gmra.mrb[0].mxu1 %v204_v12 }
 0x159   :  { %843 = vmatpush3.bf16.msra.mxu1 %v840_v22 }
 0x15a   :  { %845 = vmatprep.subr.bf16.mxu1 %v844_v24 }
 0x15d   :  { %847 = vmatpush3.bf16.msra.mxu1 %v844_v24 }
 0x15e   :  { %849 = vmatprep.subr.bf16.mxu1 %v848_v27 }
 0x161   :  { %851 = vmatpush3.bf16.msra.mxu1 %v848_v27 }
 0x162   :  { %853 = vmatprep.subr.bf16.mxu1 %v852_v30 }
 0x165   :  { %855 = vmatpush3.bf16.msra.mxu1 %v852_v30 }
 0x166   :  { %857 = vmatprep.subr.bf16.mxu1 %v856_v33 }
 0x169   :  { %859 = vmatpush3.bf16.msra.mxu1 %v856_v33 }
 0x16a   :  { %861 = vmatprep.subr.bf16.mxu1 %v860_v36 }
 0x16d   :  { %863 = vmatpush3.bf16.msra.mxu1 %v860_v36 }
 0x16e   :  { %865 = vmatprep.subr.bf16.mxu1 %v864_v48 }
 0x171   :  { %867 = vmatpush3.bf16.msra.mxu1 %v864_v48 }
 0x172   :  { %869 = vmatprep.subr.bf16.mxu1 %v868_v51 }
 0x175   :  { %871 = vmatpush3.bf16.msra.mxu1 %v868_v51 }
 0x22b   :  { %v673_v38 = vpop.f32.mrb[0].mxu1 }
 0x22c   :  { %v300_v39 = vadd.f32 %v673_v38, %v529_v37  ;;  %v294_v40 = vpop.f32.mrb[1].mxu1 }
 0x22d   :  { %v295_v41 = vadd.f32 %v529_v37, %v294_v40 }
 0x22e   :  { %v304_v42 = vmul.f32 0.01, %v300_v39 }
 0x22f   :  { %v303_v43 = vmul.f32 0.01, %v295_v41 }
 0x230   :  { %v306_v45 = vmax.f32 %v300_v39, %v304_v42 }
 0x231   :  { %v305_v44 = vmax.f32 %v295_v41, %v303_v43 }
 0x233   :  { %706 = vmatprep.mubr.f32.mxu0 %v305_v44 }
 0x234   :  { %707 = vmatmul.mubr.f32.vlgmr.msra.gmra.mrb[2].mxu0 %v306_v45 }
 0x307   :  { %v708_v53 = vpop.f32.mrb[2].mxu0 }
 0x308   :  { %v402_v54 = vadd.f32 %v708_v53, %v530_v52  ;;  %v396_v55 = vpop.f32.mrb[3].mxu0 }
 0x309   :  { %v397_v56 = vadd.f32 %v530_v52, %v396_v55 }
 0x30a   :  { %v406_v57 = vmul.f32 0.01, %v402_v54 }
 0x30b   :  { %v405_v58 = vmul.f32 0.01, %v397_v56 }
 0x30c   :  { %v408_v60 = vmax.f32 %v402_v54, %v406_v57 }
 0x30d   :  { %v407_v59 = vmax.f32 %v397_v56, %v405_v58 }
 0x30f   :  { %741 = vmatprep.mubr.f32.mxu1 %v407_v59 }
 0x310   :  { %742 = vmatmul.mubr.f32.vlgmr.msra.gmra.mrb[2].mxu1 %v408_v60 }
 0x3e3   :  { %v743_v62 = vpop.f32.mrb[2].mxu1 }
 0x3e4   :  { %v504_v63 = vadd.f32 %v743_v62, %v531_v61  ;;  %v498_v0 = vpop.f32.mrb[3].mxu1 }
 0x3e5   :  { %v499_v1 = vadd.f32 %v531_v61, %v498_v0 }
 0x3e6   :  { %508 = vst [vmem:[#allocation11 + $0x8] sm:$0xff] %v504_v63 }
 0x3e7   :  { %507 = vst [vmem:[#allocation11] sm:$0xff] %v499_v1 }
 0x3e8   :  { %1001 = shalt.err (!%p998_p2)
}
 0x3e9   :  { %s1002_s8 = scalar_lea.hbm %s1203_s9, 256 }
 0x3ea   :  { %p1003_p3 = scmp.ne.s32.totalorder %s1203_s9, %s1002_s8  ;;  %p1006_p4 = scmp.lt.u32.totalorder %s1002_s8, %s1203_s9 }
 0x3ec   :  { %p1008_p5 = pnand %p1006_p4, %p1003_p3 }
 0x3ee   :  { %1011 = shalt.err (!%p1008_p5)
}
 0x3ef   :  { %520 = dma.vmem_to_hbm [thread:$0]  %s515_s1, 256, %s1203_s9, [#allocation4], %s1022_s21, %s1022_s21, %s1023_s22  }
 0x3f0   :  { %1018 = dma.done.wait [#allocation4], 256  }
 0x3f1   :  { %1019 = vsyncadd [#allocation4], 4294967040 }
 0x3f2   :  { %524 = vsyncpa [#allocation3], 1 }
 0x3f3   :  { %525 = vsyncpa [#allocation6], 1 }
 0x3f4   :  { %526 = vsyncpa [#allocation9], 1 }
 0x3f5   :  { %527 = vsyncpa [#allocation4], 1 }

</bundles_post_ra>
